<compile_context>
chip_gen: v7x
topology: tpu7x:2x2x1
jax: 0.10.0
libtpu: 0.0.40
codegen_flags: <defaults>
</compile_context>

<pallas_src>
import functools

import jax
import jax.numpy as jnp
from jax.experimental import pallas as pl
from jax.experimental.pallas import tpu as pltpu

K_FEATURES = 32 * 32 * 3   # 3072
N_OUT = 10
N_PAD = 128                # minimum lane-dense output width (unmasked vst)
TM_DEFAULT = 1024          # batch tile; bf16 x => ~6 MiB per pipeline buffer


def _linear_kernel(x_ref, w_ref, b_ref, o_ref):
    # x_ref: (TM, K) bf16, w_ref: (K, N_PAD) bf16 (grid-invariant, single-
    # buffered), b_ref: (1, N_PAD) f32, o_ref: (TM, N_PAD) f32.
    # MXU matmul accumulates in f32; bias add and store stay f32.
    o_ref[...] = (
        jnp.dot(x_ref[...], w_ref[...], preferred_element_type=jnp.float32)
        + b_ref[...]
    )


def prepare_params(weight, bias):
    """One-time parameter prep (hoisted out of the hot path):
    transpose (10,3072)->(3072,10), zero-pad the output dim to 128 so kernel
    stores are lane-dense, and store the weight in bf16 (accumulation is f32).
    Padded columns are zero, so the 10 valid logits are untouched."""
    K = weight.shape[1]
    w_t_pad = (
        jnp.zeros((K, N_PAD), jnp.float32).at[:, :N_OUT].set(weight.T)
    ).astype(jnp.bfloat16)
    b_row_pad = jnp.zeros((1, N_PAD), jnp.float32).at[:, :N_OUT].set(bias)
    return w_t_pad, b_row_pad


def _round_up(v, m):
    return ((v + m - 1) // m) * m


@functools.partial(jax.jit, static_argnames=("tm",))
def lazynet_forward(x_nchw, w_t_pad, b_row_pad, *, tm=TM_DEFAULT):
    """x_nchw: (B, 3, 32, 32) f32 (or bf16); w_t_pad: (3072, 128) bf16;
    b_row_pad: (1, 128) f32.  Returns (B, 10) f32 logits."""
    B = x_nchw.shape[0]
    K = w_t_pad.shape[0]

    # Row-major flatten == torch .view(-1, 3072); stream as bf16 to halve the
    # bytes on the mem-bound x stream.  (In a real pipeline the producer
    # would emit bf16 directly, making the cast free.)
    x_flat = x_nchw.reshape(B, K).astype(jnp.bfloat16)

    # Batch tile: multiple of 16 sublanes (bf16 packs 2 rows/sublane), capped
    # at `tm`, and capped so the grid has >= 4 steps when B allows -> the
    # "parallel" axis can split across v7x's two TensorCores and the x stream
    # keeps real double-buffered prefetch/compute overlap.
    tm_eff = min(tm, _round_up(pl.cdiv(B, 4), 16))
    # No whole-batch pad: the final block may be partial; OOB output rows are
    # dropped and sliced off below (rows are independent, no cross-row work).
    grid = (pl.cdiv(B, tm_eff),)

    out = pl.pallas_call(
        _linear_kernel,
        out_shape=jax.ShapeDtypeStruct((B, N_PAD), jnp.float32),
        grid_spec=pltpu.PrefetchScalarGridSpec(
            num_scalar_prefetch=0,
            grid=grid,
            in_specs=[
                # x streams tile-by-tile over the batch (double-buffered).
                pl.BlockSpec((tm_eff, K), lambda i: (i, 0)),
                # Weight / bias are grid-invariant: DMA'd once, single buffer.
                pl.BlockSpec((K, N_PAD), lambda i: (0, 0),
                             pipeline_mode=pl.Buffered(1)),
                pl.BlockSpec((1, N_PAD), lambda i: (0, 0),
                             pipeline_mode=pl.Buffered(1)),
            ],
            out_specs=pl.BlockSpec((tm_eff, N_PAD), lambda i: (i, 0)),
        ),
        compiler_params=pltpu.CompilerParams(
            # Batch tiles are independent -> shard across v7x's two TCs
            # (no-op on single-TC v5e/v6e).
            dimension_semantics=("parallel",),
            # Peak ~14 MiB at TM=1024 with bf16 x; 32 MiB is safe on all gens
            # and is required explicitly on v5e (16 MiB default scoped limit).
            vmem_limit_bytes=32 * 1024 * 1024,
        ),
    )(x_flat, w_t_pad, b_row_pad)

    # Strip any partial-tile rows and the zero-padded output columns.
    return out[:B, :N_OUT]


def init_params(key, in_features=K_FEATURES, out_features=N_OUT):
    # Deterministic init mimicking nn.Linear's uniform(-1/sqrt(K), 1/sqrt(K)).
    kw, kb = jax.random.split(key)
    bound = 1.0 / jnp.sqrt(jnp.float32(in_features))
    weight = jax.random.uniform(kw, (out_features, in_features),
                                jnp.float32, -bound, bound)
    bias = jax.random.uniform(kb, (out_features,), jnp.float32, -bound, bound)
    return weight, bias


# TODO(synk): BaseModel's logging / CrossEntropyLoss / SGD / LR schedule are
# training-time utilities with no forward-pass Pallas equivalent; omitted.

if __name__ == "__main__":
    key = jax.random.PRNGKey(0)
    kx, kp = jax.random.split(key)

    # Forward implies CIFAR-shaped input: (B, 3, 32, 32) flattened to 3072.
    # At B=2 this is a correctness demo; the tiling pays off at real batches.
    B = 2
    x = jax.random.normal(kx, (B, 3, 32, 32), dtype=jnp.float32)
    weight, bias = init_params(kp)

    # One-time parameter prep (transpose + pad + bf16 cast), out of hot path.
    w_t_pad, b_row_pad = prepare_params(weight, bias)

    out = lazynet_forward(x, w_t_pad, b_row_pad)
    out = jax.block_until_ready(out)

    # Plain-JAX f32 reference; bf16-streamed inputs (f32 accumulate) need a
    # looser tolerance than the exact-f32 path.
    ref = x.reshape(B, -1) @ weight.T + bias
    assert out.shape == (B, N_OUT)
    assert jnp.allclose(out, ref, atol=2e-2, rtol=2e-2), float(
        jnp.max(jnp.abs(out - ref)))

    print("KERNEL_OK")
</pallas_src>

<mosaic_0001>
module attributes {stable_mosaic.version = 11 : i64} {
  func.func @_linear_kernel(%arg0: i32, %arg1: memref<16x3072xbf16, #tpu.memory_space<vmem>>, %arg2: memref<3072x128xbf16, #tpu.memory_space<vmem>>, %arg3: memref<1x128xf32, #tpu.memory_space<vmem>>, %arg4: memref<16x128xf32, #tpu.memory_space<vmem>>) attributes {dimension_semantics = [#tpu.dimension_semantics<parallel>], iteration_bounds = array<i64: 1>, scalar_prefetch = 0 : i64, scratch_operands = 0 : i64, tpu.core_type = #tpu.core_type<tc>, window_params = [{transform_indices = @transform_0, window_bounds = array<i64: 16, 3072>}, {pipeline_mode = #tpu.pipeline_mode<synchronous>, transform_indices = @transform_1, window_bounds = array<i64: 3072, 128>}, {pipeline_mode = #tpu.pipeline_mode<synchronous>, transform_indices = @transform_2, window_bounds = array<i64: 1, 128>}, {transform_indices = @transform_3, window_bounds = array<i64: 16, 128>}]} {
    %c0 = arith.constant 0 : index
    %c0_0 = arith.constant 0 : index
    %0 = vector.load %arg1[%c0, %c0_0] : memref<16x3072xbf16, #tpu.memory_space<vmem>>, vector<16x3072xbf16>
    %c0_1 = arith.constant 0 : index
    %c0_2 = arith.constant 0 : index
    %1 = vector.load %arg2[%c0_1, %c0_2] : memref<3072x128xbf16, #tpu.memory_space<vmem>>, vector<3072x128xbf16>
    %cst = arith.constant dense<0.000000e+00> : vector<16x128xf32>
    %2 = tpu.matmul %0, %1, %cst {dimension_numbers = #tpu.dot_dimension_numbers<[1], [0], [0], [1], [0, 0, 1, 1], [], []>} : vector<16x3072xbf16>, vector<3072x128xbf16>, vector<16x128xf32> -> vector<16x128xf32>
    %c0_3 = arith.constant 0 : index
    %c0_4 = arith.constant 0 : index
    %3 = vector.load %arg3[%c0_3, %c0_4] : memref<1x128xf32, #tpu.memory_space<vmem>>, vector<1x128xf32>
    %4 = vector.broadcast %3 : vector<1x128xf32> to vector<16x128xf32>
    %5 = arith.addf %2, %4 : vector<16x128xf32>
    %c0_5 = arith.constant 0 : index
    %c0_6 = arith.constant 0 : index
    %6 = vector.load %arg4[%c0_5, %c0_6] : memref<16x128xf32, #tpu.memory_space<vmem>>, vector<16x128xf32>
    tpu.vector_store %arg4[%c0_5, %c0_6], %5 {strides = array<i32>} : memref<16x128xf32, #tpu.memory_space<vmem>>, vector<16x128xf32>,
    return
  }
  func.func @transform_0(%arg0: i32) -> (i32, i32) {
    %c0_i32 = arith.constant 0 : i32
    %c0_i32_0 = arith.constant 0 : i32
    return %arg0, %c0_i32 : i32, i32
  }
  func.func @transform_1(%arg0: i32) -> (i32, i32) {
    %c0_i32 = arith.constant 0 : i32
    %c0_i32_0 = arith.constant 0 : i32
    %c0_i32_1 = arith.constant 0 : i32
    return %c0_i32, %c0_i32_0 : i32, i32
  }
  func.func @transform_2(%arg0: i32) -> (i32, i32) {
    %c0_i32 = arith.constant 0 : i32
    %c0_i32_0 = arith.constant 0 : i32
    %c0_i32_1 = arith.constant 0 : i32
    return %c0_i32, %c0_i32_0 : i32, i32
  }
  func.func @transform_3(%arg0: i32) -> (i32, i32) {
    %c0_i32 = arith.constant 0 : i32
    %c0_i32_0 = arith.constant 0 : i32
    return %arg0, %c0_i32 : i32, i32
  }
}

</mosaic_0001>

<bundles_post_ra>
// kernel: lazynet_forward.1
= control target key start
LH: loop header
LB: loop body
LE: loop exit
PB: predicated region body
PF: predicated region fallthrough
CT: control target
= control target key end

     0   :  { %8 = vsyncpa [#allocation3], 0  ;;  %s3496_s0 = inlined_call_operand.vmem [shape: bf16[2,3072], index: 0, kind: input, shape index: {}]   ;;  %s3497_s1 = inlined_call_operand.hbm [shape: bf16[3072,128], index: 1, kind: input, shape index: {}]   ;;  %s3498_s2 = inlined_call_operand.vmem [shape: f32[1,128], index: 2, kind: input, shape index: {}]   ;;  %s3499_s3 = inlined_call_operand.hbm [shape: f32[2,128], index: 3, kind: output, shape index: {}]  }
   0x1   :  { %9 = vsyncpa [#allocation4], 0  ;;  %s3304_s12 = smov [#allocation2]   ;;  %s3256_s16 = scalar_lea.hbm %s3497_s1, 24576 }
   0x2   :  { %s17_s13 = sshll.u32 %s3304_s12, 4  ;;  %p3257_p0 = scmp.ne.s32.totalorder %s3497_s1, %s3256_s16  ;;  %s18_s13 = int_to_ptr.vmem [resolvable:$true] %s17_s13 }
   0x3   :  { %p3260_p1 = scmp.lt.u32.totalorder %s3256_s16, %s3497_s1 }
   0x5   :  { %p3262_p2 = pnand %p3260_p1, %p3257_p0 }
   0x7   :  { %3265 = shalt.err (!%p3262_p2)
}
   0x8   :  { %s3266_s21 = scalar_lea.vmem %s18_s13, 24576  ;;  %p3271_p4 = scmp.lt.s32.totalorder %s18_s13, %s18_s13 }
   0x9   :  { %p3267_p3 = scmp.ne.s32.totalorder %s18_s13, %s3266_s21  ;;  %p3272_p5 = scmp.lt.s32.totalorder %s3266_s21, %s3266_s21 }
   0xb   :  { %p3273_p6 = por %p3272_p5, %p3271_p4 }
   0xd   :  { %p3274_p7 = pnand %p3273_p6, %p3267_p3 }
   0xf   :  { %3277 = shalt.err (!%p3274_p7)
}
  0x10   :  { %s3305_s22 = smov 64   ;;  %s3306_s23 = smov 4  }
  0x11   :  { %23 = dma.hbm_to_vmem [thread:$0]  %s3497_s1, 24576, %s18_s13, [#allocation3], %s3305_s22, %s3305_s22, %s3306_s23  }
  0x12   :  { %3300 = dma.done.wait [#allocation3], 24576  }
  0x13   :  { %3301 = vsyncadd [#allocation3], 4294942720  ;;  %v3028_v0 = vld [vmem:[#allocation2 + $0x40] sm:$0xff]   ;;  %v3032_v4 = vld [vmem:[#allocation2 + $0x48] sm:$0xff]   ;;  %v3307_v25 = vmov 1966171168   ;;  %v480_v27 = vlaneseq }
  0x14   :  { %v3029_v1 = vld [vmem:[#allocation2 + $0xc0] sm:$0xff]   ;;  %2757 = vmatprep.subr.bf16.mxu0 %v3028_v0  ;;  %v3033_v5 = vld [vmem:[#allocation2 + $0xc8] sm:$0xff]   ;;  %v3036_v8 = vld [vmem:[#allocation2 + $0x50] sm:$0xff]   ;;  %v478_v26 = vunpack.c.l.s4 %v3307_v25 }
  0x15   :  { %v3030_v2 = vld [vmem:[#allocation2] sm:$0xff]   ;;  %2779 = vmatprep.subr.bf16.mxu1 %v3029_v1  ;;  %v3034_v6 = vld [vmem:[#allocation2 + $0x8] sm:$0xff]   ;;  %v3037_v9 = vld [vmem:[#allocation2 + $0xd0] sm:$0xff]   ;;  %v481_v33 = vshrl.u32 %v480_v27, 7 }
  0x16   :  { %v3031_v3 = vld [vmem:[#allocation2 + $0x80] sm:$0xff]   ;;  %2758 = vmatpush3.bf16.msra.mxu0 %v3030_v2  ;;  %v3035_v7 = vld [vmem:[#allocation2 + $0x88] sm:$0xff]   ;;  %v3038_v10 = vld [vmem:[#allocation2 + $0x10] sm:$0xff]   ;;  %v479_v32 = vunpack.c.0.s8 %v478_v26 }
  0x17   :  { %2780 = vmatpush3.bf16.msra.mxu1 %v3031_v3  ;;  %2759 = vmatprep.subr.bf16.mxu0 %v3032_v4  ;;  %v3039_v11 = vld [vmem:[#allocation2 + $0x90] sm:$0xff]   ;;  %v3040_v12 = vld [vmem:[#allocation2 + $0x58] sm:$0xff]   ;;  %v3044_v16 = vld [vmem:[#allocation2 + $0x60] sm:$0xff]  }
  0x18   :  { %2781 = vmatprep.subr.bf16.mxu1 %v3033_v5  ;;  %v3041_v13 = vld [vmem:[#allocation2 + $0xd8] sm:$0xff]   ;;  %v3045_v17 = vld [vmem:[#allocation2 + $0xe0] sm:$0xff]   ;;  %v3048_v20 = vld [vmem:[#allocation2 + $0x68] sm:$0xff]   ;;  %v3343_v37 = vsub.s32 %v479_v32, %v481_v33 }
  0x19   :  { %v3042_v14 = vld [vmem:[#allocation2 + $0x18] sm:$0xff]   ;;  %v3046_v18 = vld [vmem:[#allocation2 + $0x20] sm:$0xff]   ;;  %v3049_v21 = vld [vmem:[#allocation2 + $0xe8] sm:$0xff]  }
  0x1a   :  { %2760 = vmatpush3.bf16.msra.mxu0 %v3034_v6  ;;  %v3043_v15 = vld [vmem:[#allocation2 + $0x98] sm:$0xff]   ;;  %v3047_v19 = vld [vmem:[#allocation2 + $0xa0] sm:$0xff]   ;;  %v3050_v22 = vld [vmem:[#allocation2 + $0x28] sm:$0xff]  }
  0x1b   :  { %2782 = vmatpush3.bf16.msra.mxu1 %v3035_v7  ;;  %2761 = vmatprep.subr.bf16.mxu0 %v3036_v8  ;;  %v3051_v23 = vld [vmem:[#allocation2 + $0xa8] sm:$0xff]   ;;  %v3052_v24 = vld [vmem:[#allocation2 + $0x70] sm:$0xff]   ;;  %v3056_v31 = vld [vmem:[#allocation2 + $0x78] sm:$0xff]  }
  0x1c   :  { %2783 = vmatprep.subr.bf16.mxu1 %v3037_v9  ;;  %v3053_v28 = vld [vmem:[#allocation2 + $0xf0] sm:$0xff]   ;;  %v3057_v34 = vld [vmem:[#allocation2 + $0xf8] sm:$0xff]   ;;  %v3072_v52 = vld [vmem:[#allocation2 + $0x140] sm:$0xff]  }
  0x1d   :  { %v3054_v29 = vld [vmem:[#allocation2 + $0x30] sm:$0xff]   ;;  %v3058_v35 = vld [vmem:[#allocation2 + $0x38] sm:$0xff]   ;;  %v3073_v56 = vld [vmem:[#allocation2 + $0x1c0] sm:$0xff]  }
  0x1e   :  { %2762 = vmatpush3.bf16.msra.mxu0 %v3038_v10  ;;  %v3055_v30 = vld [vmem:[#allocation2 + $0xb0] sm:$0xff]   ;;  %v3059_v36 = vld [vmem:[#allocation2 + $0xb8] sm:$0xff]   ;;  %v3074_v2 = vld [vmem:[#allocation2 + $0x100] sm:$0xff]  }
  0x1f   :  { %2784 = vmatpush3.bf16.msra.mxu1 %v3039_v11  ;;  %2763 = vmatprep.subr.bf16.mxu0 %v3040_v12  ;;  %v3060_v38 = vld [vmem:[%s3496_s0] ss:$24 sps:$4 sm:$0xff]   ;;  %v3062_v39 = vld [vmem:[%s3496_s0 + $0x4] ss:$24 sps:$4 sm:$0xff]   ;;  %v3063_v40 = vld [vmem:[%s3496_s0 + $0x30] ss:$24 sps:$4 sm:$0xff]  }
  0x20   :  { %2785 = vmatprep.subr.bf16.mxu1 %v3041_v13  ;;  %v3065_v41 = vld [vmem:[%s3496_s0 + $0x34] ss:$24 sps:$4 sm:$0xff]   ;;  %v3066_v42 = vld [vmem:[%s3496_s0 + $0x60] ss:$24 sps:$4 sm:$0xff]   ;;  %v3068_v43 = vld [vmem:[%s3496_s0 + $0x64] ss:$24 sps:$4 sm:$0xff]   ;;  %v483_v45 = vrot.slane %v3060_v38, %v3343_v37  ;;  %v497_v47 = vrot.slane %v3063_v40, %v3343_v37  ;;  %v3372_v48 = vrot.slane %v3062_v39, %v3343_v37 }
  0x21   :  { %v3069_v44 = vld [vmem:[%s3496_s0 + $0x90] ss:$24 sps:$4 sm:$0xff]   ;;  %v3071_v46 = vld [vmem:[%s3496_s0 + $0x94] ss:$24 sps:$4 sm:$0xff]   ;;  %v3375_v49 = vrot.slane %v3065_v41, %v3343_v37  ;;  %v511_v50 = vrot.slane %v3066_v42, %v3343_v37  ;;  %v3380_v53 = vrot.slane %v3068_v43, %v3343_v37  ;;  %v3075_v4 = vld [vmem:[#allocation2 + $0x180] sm:$0xff]  }
  0x22   :  { %2764 = vmatpush3.bf16.msra.mxu0 %v3042_v14  ;;  %v525_v51 = vrot.slane %v3069_v44, %v3343_v37  ;;  %v534_v54 = vcombine.high %v483_v45, %v497_v47  ;;  %v533_v55 = vcombine.low %v483_v45, %v497_v47  ;;  %v3383_v57 = vrot.slane %v3071_v46, %v3343_v37  ;;  %v3076_v10 = vld [vmem:[#allocation2 + $0x148] sm:$0xff]   ;;  %v3089_v25 = vld [vmem:[#allocation2 + $0x1e0] sm:$0xff]   ;;  %v3096_v32 = vld [vmem:[#allocation2 + $0x170] sm:$0xff]  }
  0x23   :  { %2786 = vmatpush3.bf16.msra.mxu1 %v3043_v15  ;;  %2765 = vmatprep.subr.bf16.mxu0 %v3044_v16  ;;  %v536_v58 = vcombine.high %v3372_v48, %v3375_v49  ;;  %v3077_v11 = vld [vmem:[#allocation2 + $0x1c8] sm:$0xff]   ;;  %v3080_v16 = vld [vmem:[#allocation2 + $0x150] sm:$0xff]   ;;  %v3090_v26 = vld [vmem:[#allocation2 + $0x120] sm:$0xff]  }
  0x24   :  { %2787 = vmatprep.subr.bf16.mxu1 %v3045_v17  ;;  %v538_v59 = vcombine.high %v511_v50, %v525_v51  ;;  %v537_v60 = vcombine.low %v511_v50, %v525_v51  ;;  %v561_v61 = vrot.slane %v534_v54, %v3343_v37  ;;  %v547_v62 = vrot.slane %v533_v55, %v3343_v37  ;;  %v3078_v12 = vld [vmem:[#allocation2 + $0x108] sm:$0xff]   ;;  %v3081_v17 = vld [vmem:[#allocation2 + $0x1d0] sm:$0xff]   ;;  %v3091_v27 = vld [vmem:[#allocation2 + $0x1a0] sm:$0xff]  }
  0x25   :  { %v540_v63 = vcombine.high %v3380_v53, %v3383_v57  ;;  %v568_v3 = vrot.slane %v536_v58, %v3343_v37  ;;  %v3079_v15 = vld [vmem:[#allocation2 + $0x188] sm:$0xff]   ;;  %v3097_v33 = vld [vmem:[#allocation2 + $0x1f0] sm:$0xff]   ;;  %v539_v38 = vcombine.low %v3380_v53, %v3383_v57  ;;  %v3100_v39 = vld [vmem:[#allocation2 + $0x178] sm:$0xff]  }
  0x26   :  { %2766 = vmatpush3.bf16.msra.mxu0 %v3046_v18  ;;  %v589_v0 = vrot.slane %v538_v59, %v3343_v37  ;;  %v575_v1 = vrot.slane %v537_v60, %v3343_v37  ;;  %v3082_v18 = vld [vmem:[#allocation2 + $0x110] sm:$0xff]   ;;  %v3101_v40 = vld [vmem:[#allocation2 + $0x1f8] sm:$0xff]   ;;  %v3104_v45 = vld [vmem:[#allocation2 + $0x240] sm:$0xff]  }
  0x27   :  { %2788 = vmatpush3.bf16.msra.mxu1 %v3047_v19  ;;  %2767 = vmatprep.subr.bf16.mxu0 %v3048_v20  ;;  %v596_v5 = vrot.slane %v540_v63, %v3343_v37  ;;  %v3083_v19 = vld [vmem:[#allocation2 + $0x190] sm:$0xff]   ;;  %v3084_v20 = vld [vmem:[#allocation2 + $0x158] sm:$0xff]   ;;  %v582_v44 = vrot.slane %v539_v38, %v3343_v37  ;;  %v3105_v46 = vld [vmem:[#allocation2 + $0x2c0] sm:$0xff]  }
  0x28   :  { %2789 = vmatprep.subr.bf16.mxu1 %v3049_v21  ;;  %v601_v6 = vcombine.low %v561_v61, %v589_v0  ;;  %v602_v7 = vcombine.high %v561_v61, %v589_v0  ;;  %v597_v8 = vcombine.low %v547_v62, %v575_v1  ;;  %v598_v9 = vcombine.high %v547_v62, %v575_v1  ;;  %v3085_v21 = vld [vmem:[#allocation2 + $0x1d8] sm:$0xff]   ;;  %v3106_v47 = vld [vmem:[#allocation2 + $0x200] sm:$0xff]   ;;  %v3108_v51 = vld [vmem:[#allocation2 + $0x248] sm:$0xff]  }
  0x29   :  { %v603_v13 = vcombine.low %v568_v3, %v596_v5  ;;  %v604_v14 = vcombine.high %v568_v3, %v596_v5  ;;  %v3102_v41 = vld [vmem:[#allocation2 + $0x138] sm:$0xff]   ;;  %v3107_v50 = vld [vmem:[#allocation2 + $0x280] sm:$0xff]   ;;  %v3110_v53 = vld [vmem:[#allocation2 + $0x208] sm:$0xff]  }
  0x2a   :  { %2768 = vmatpush3.bf16.msra.mxu0 %v3050_v22  ;;  %2085 = vmatprep.mubr.bf16.mxu0 %v601_v6  ;;  %v3086_v22 = vld [vmem:[#allocation2 + $0x118] sm:$0xff]   ;;  %v3111_v54 = vld [vmem:[#allocation2 + $0x288] sm:$0xff]   ;;  %v3112_v55 = vld [vmem:[#allocation2 + $0x250] sm:$0xff]  }
  0x2b   :  { %2790 = vmatpush3.bf16.msra.mxu1 %v3051_v23  ;;  %2769 = vmatprep.subr.bf16.mxu0 %v3052_v24  ;;  %v3087_v23 = vld [vmem:[#allocation2 + $0x198] sm:$0xff]   ;;  %v3088_v24 = vld [vmem:[#allocation2 + $0x160] sm:$0xff]   ;;  %v3114_v57 = vld [vmem:[#allocation2 + $0x210] sm:$0xff]  }
  0x2c   :  { %2791 = vmatprep.subr.bf16.mxu1 %v3053_v28  ;;  %2126 = vmatprep.mubr.bf16.mxu1 %v602_v7  ;;  %v3092_v28 = vld [vmem:[#allocation2 + $0x168] sm:$0xff]   ;;  %v3103_v42 = vld [vmem:[#allocation2 + $0x1b8] sm:$0xff]   ;;  %v3115_v58 = vld [vmem:[#allocation2 + $0x290] sm:$0xff]  }
  0x2d   :  { %v3116_v59 = vld [vmem:[#allocation2 + $0x258] sm:$0xff]   ;;  %v3120_v63 = vld [vmem:[#allocation2 + $0x260] sm:$0xff]   ;;  %v3124_v3 = vld [vmem:[#allocation2 + $0x268] sm:$0xff]  }
  0x2e   :  { %2770 = vmatpush3.bf16.msra.mxu0 %v3054_v29  ;;  %v3093_v29 = vld [vmem:[#allocation2 + $0x1e8] sm:$0xff]   ;;  %v3117_v60 = vld [vmem:[#allocation2 + $0x2d8] sm:$0xff]   ;;  %v3121_v0 = vld [vmem:[#allocation2 + $0x2e0] sm:$0xff]  }
  0x2f   :  { %2792 = vmatpush3.bf16.msra.mxu1 %v3055_v30  ;;  %2771 = vmatprep.subr.bf16.mxu0 %v3056_v31  ;;  %v3094_v30 = vld [vmem:[#allocation2 + $0x128] sm:$0xff]   ;;  %v3118_v61 = vld [vmem:[#allocation2 + $0x218] sm:$0xff]   ;;  %v3122_v1 = vld [vmem:[#allocation2 + $0x220] sm:$0xff]  }
  0x30   :  { %2793 = vmatprep.subr.bf16.mxu1 %v3057_v34  ;;  %v3095_v31 = vld [vmem:[#allocation2 + $0x1a8] sm:$0xff]   ;;  %v3098_v34 = vld [vmem:[#allocation2 + $0x130] sm:$0xff]   ;;  %v3119_v62 = vld [vmem:[#allocation2 + $0x298] sm:$0xff]  }
  0x31   :  { %v3126_v5 = vld [vmem:[#allocation2 + $0x228] sm:$0xff]   ;;  %v3128_v7 = vld [vmem:[#allocation2 + $0x270] sm:$0xff]  }
  0x32   :  { %2772 = vmatpush3.bf16.msra.mxu0 %v3058_v35  ;;  %v3099_v35 = vld [vmem:[#allocation2 + $0x1b0] sm:$0xff]   ;;  %v3127_v6 = vld [vmem:[#allocation2 + $0x2a8] sm:$0xff]  }
  0x33   :  { %2794 = vmatpush3.bf16.msra.mxu1 %v3059_v36  ;;  %2801 = vmatprep.subr.bf16.mxu0 %v3072_v52  ;;  %v535_v36 = vcombine.low %v3372_v48, %v3375_v49  ;;  %v3109_v52 = vld [vmem:[#allocation2 + $0x2c8] sm:$0xff]  }
  0x34   :  { %2823 = vmatprep.subr.bf16.mxu1 %v3073_v56  ;;  %v3113_v56 = vld [vmem:[#allocation2 + $0x2d0] sm:$0xff]  }
  0x35   :  { %2086 = vmatmul.mubr.bf16.vlgmr.msra.gmra.mrb[0].mxu0 %v597_v8  ;;  %v554_v43 = vrot.slane %v535_v36, %v3343_v37  ;;  %v3129_v8 = vld [vmem:[#allocation2 + $0x2f0] sm:$0xff]  }
  0x36   :  { %2127 = vmatmul.mubr.bf16.vlgmr.msra.gmra.mrb[0].mxu1 %v598_v9  ;;  %2802 = vmatpush3.bf16.msra.mxu0 %v3074_v2  ;;  %v3123_v2 = vld [vmem:[#allocation2 + $0x2a0] sm:$0xff]   ;;  %v3130_v9 = vld [vmem:[#allocation2 + $0x230] sm:$0xff]  }
  0x37   :  { %2824 = vmatpush3.bf16.msra.mxu1 %v3075_v4  ;;  %2803 = vmatprep.subr.bf16.mxu0 %v3076_v10  ;;  %v599_v48 = vcombine.low %v554_v43, %v582_v44  ;;  %v600_v49 = vcombine.high %v554_v43, %v582_v44  ;;  %v3125_v4 = vld [vmem:[#allocation2 + $0x2e8] sm:$0xff]   ;;  %v3131_v10 = vld [vmem:[#allocation2 + $0x2b0] sm:$0xff]  }
  0x38   :  { %2825 = vmatprep.subr.bf16.mxu1 %v3077_v11  ;;  %2167 = vmatprep.mubr.bf16.mxu0 %v603_v13  ;;  %v3132_v11 = vld [vmem:[#allocation2 + $0x278] sm:$0xff]   ;;  %v3151_v43 = vld [vmem:[#allocation2 + $0x388] sm:$0xff]   ;;  %v3152_v44 = vld [vmem:[#allocation2 + $0x350] sm:$0xff]  }
  0x39   :  { %2208 = vmatprep.mubr.bf16.mxu1 %v604_v14  ;;  %v3134_v13 = vld [vmem:[#allocation2 + $0x238] sm:$0xff]  }
  0x3a   :  { %2804 = vmatpush3.bf16.msra.mxu0 %v3078_v12  ;;  %v3133_v12 = vld [vmem:[#allocation2 + $0x2f8] sm:$0xff]  }
  0x3b   :  { %2826 = vmatpush3.bf16.msra.mxu1 %v3079_v15  ;;  %2805 = vmatprep.subr.bf16.mxu0 %v3080_v16  ;;  %v3135_v14 = vld [vmem:[#allocation2 + $0x2b8] sm:$0xff]   ;;  %v3136_v15 = vld [vmem:[%s3496_s0 + $0x8] ss:$24 sps:$4 sm:$0xff]  }
  0x3c   :  { %2827 = vmatprep.subr.bf16.mxu1 %v3081_v17  ;;  %v3138_v16 = vld [vmem:[%s3496_s0 + $0x38] ss:$24 sps:$4 sm:$0xff]   ;;  %v3140_v17 = vld [vmem:[%s3496_s0 + $0x68] ss:$24 sps:$4 sm:$0xff]  }
  0x3e   :  { %2806 = vmatpush3.bf16.msra.mxu0 %v3082_v18  ;;  %v3142_v18 = vld [vmem:[%s3496_s0 + $0x98] ss:$24 sps:$4 sm:$0xff]  }
  0x3f   :  { %2828 = vmatpush3.bf16.msra.mxu1 %v3083_v19  ;;  %2807 = vmatprep.subr.bf16.mxu0 %v3084_v20  ;;  %v619_v19 = vrot.slane %v3136_v15, %v3343_v37  ;;  %v633_v20 = vrot.slane %v3138_v16, %v3343_v37  ;;  %v3180_v16 = vld [vmem:[#allocation2 + $0x440] sm:$0xff]  }
  0x40   :  { %2829 = vmatprep.subr.bf16.mxu1 %v3085_v21  ;;  %v647_v21 = vrot.slane %v3140_v17, %v3343_v37 }
  0x42   :  { %2808 = vmatpush3.bf16.msra.mxu0 %v3086_v22  ;;  %v3144_v22 = vld [vmem:[#allocation2 + $0x340] sm:$0xff]  }
  0x43   :  { %2830 = vmatpush3.bf16.msra.mxu1 %v3087_v23  ;;  %2809 = vmatprep.subr.bf16.mxu0 %v3088_v24  ;;  %v661_v23 = vrot.slane %v3142_v18, %v3343_v37  ;;  %v3145_v24 = vld [vmem:[#allocation2 + $0x3c0] sm:$0xff]  }
  0x44   :  { %2831 = vmatprep.subr.bf16.mxu1 %v3089_v25  ;;  %v670_v25 = vcombine.high %v619_v19, %v633_v20 }
  0x46   :  { %2810 = vmatpush3.bf16.msra.mxu0 %v3090_v26  ;;  %v669_v26 = vcombine.low %v619_v19, %v633_v20  ;;  %v3181_v19 = vld [vmem:[#allocation2 + $0x4c0] sm:$0xff]  }
  0x47   :  { %2832 = vmatpush3.bf16.msra.mxu1 %v3091_v27  ;;  %2811 = vmatprep.subr.bf16.mxu0 %v3092_v28  ;;  %v674_v27 = vcombine.high %v647_v21, %v661_v23  ;;  %v673_v28 = vcombine.low %v647_v21, %v661_v23  ;;  %v3183_v23 = vld [vmem:[#allocation2 + $0x480] sm:$0xff]  }
  0x48   :  { %2833 = vmatprep.subr.bf16.mxu1 %v3093_v29  ;;  %v697_v29 = vrot.slane %v670_v25, %v3343_v37 }
  0x4a   :  { %2812 = vmatpush3.bf16.msra.mxu0 %v3094_v30  ;;  %v683_v30 = vrot.slane %v669_v26, %v3343_v37 }
  0x4b   :  { %2834 = vmatpush3.bf16.msra.mxu1 %v3095_v31  ;;  %2813 = vmatprep.subr.bf16.mxu0 %v3096_v32  ;;  %v725_v31 = vrot.slane %v674_v27, %v3343_v37  ;;  %v711_v32 = vrot.slane %v673_v28, %v3343_v37  ;;  %v3184_v28 = vld [vmem:[#allocation2 + $0x448] sm:$0xff]  }
  0x4c   :  { %2835 = vmatprep.subr.bf16.mxu1 %v3097_v33  ;;  %v3146_v33 = vld [vmem:[#allocation2 + $0x300] sm:$0xff]  }
  0x4d   :  { %v738_v36 = vcombine.high %v697_v29, %v725_v31  ;;  %v733_v38 = vcombine.low %v683_v30, %v711_v32 }
  0x4e   :  { %2814 = vmatpush3.bf16.msra.mxu0 %v3098_v34  ;;  %v3147_v34 = vld [vmem:[#allocation2 + $0x380] sm:$0xff]  }
  0x4f   :  { %2836 = vmatpush3.bf16.msra.mxu1 %v3099_v35  ;;  %2815 = vmatprep.subr.bf16.mxu0 %v3100_v39  ;;  %v737_v35 = vcombine.low %v697_v29, %v725_v31  ;;  %v734_v39 = vcombine.high %v683_v30, %v711_v32  ;;  %v3185_v29 = vld [vmem:[#allocation2 + $0x4c8] sm:$0xff]   ;;  %v3188_v32 = vld [vmem:[#allocation2 + $0x450] sm:$0xff]  }
  0x50   :  { %2837 = vmatprep.subr.bf16.mxu1 %v3101_v40  ;;  %v3148_v40 = vld [vmem:[#allocation2 + $0x348] sm:$0xff]  }
  0x51   :  { %v3186_v30 = vld [vmem:[#allocation2 + $0x408] sm:$0xff]  }
  0x52   :  { %2816 = vmatpush3.bf16.msra.mxu0 %v3102_v41  ;;  %v3149_v41 = vld [vmem:[#allocation2 + $0x3c8] sm:$0xff]  }
  0x53   :  { %2838 = vmatpush3.bf16.msra.mxu1 %v3103_v42  ;;  %2845 = vmatprep.subr.bf16.mxu0 %v3104_v45  ;;  %v3150_v42 = vld [vmem:[#allocation2 + $0x308] sm:$0xff]   ;;  %v3153_v45 = vld [vmem:[#allocation2 + $0x3d0] sm:$0xff]  }
  0x54   :  { %2867 = vmatprep.subr.bf16.mxu1 %v3105_v46  ;;  %v3154_v46 = vld [vmem:[#allocation2 + $0x310] sm:$0xff]   ;;  %v3187_v31 = vld [vmem:[#allocation2 + $0x488] sm:$0xff]  }
  0x55   :  { %2168 = vmatmul.mubr.bf16.vlgmr.msra.gmra.mrb[4].mxu0 %v599_v48  ;;  %v3156_v48 = vld [vmem:[#allocation2 + $0x358] sm:$0xff]  }
  0x56   :  { %2209 = vmatmul.mubr.bf16.vlgmr.msra.gmra.mrb[4].mxu1 %v600_v49  ;;  %2846 = vmatpush3.bf16.msra.mxu0 %v3106_v47  ;;  %v3155_v47 = vld [vmem:[#allocation2 + $0x390] sm:$0xff]   ;;  %v3157_v49 = vld [vmem:[#allocation2 + $0x3d8] sm:$0xff]  }
  0x57   :  { %2868 = vmatpush3.bf16.msra.mxu1 %v3107_v50  ;;  %2847 = vmatprep.subr.bf16.mxu0 %v3108_v51  ;;  %v3158_v50 = vld [vmem:[#allocation2 + $0x318] sm:$0xff]  }
  0x58   :  { %2869 = vmatprep.subr.bf16.mxu1 %v3109_v52  ;;  %2249 = vmatprep.mubr.bf16.mxu0 %v737_v35  ;;  %v3159_v51 = vld [vmem:[#allocation2 + $0x398] sm:$0xff]   ;;  %v3160_v52 = vld [vmem:[#allocation2 + $0x360] sm:$0xff]   ;;  %v3191_v35 = vld [vmem:[#allocation2 + $0x490] sm:$0xff]  }
  0x59   :  { %2290 = vmatprep.mubr.bf16.mxu1 %v738_v36  ;;  %v3192_v36 = vld [vmem:[#allocation2 + $0x458] sm:$0xff]  }
  0x5a   :  { %2848 = vmatpush3.bf16.msra.mxu0 %v3110_v53  ;;  %v3161_v53 = vld [vmem:[#allocation2 + $0x3e0] sm:$0xff]  }
  0x5b   :  { %2870 = vmatpush3.bf16.msra.mxu1 %v3111_v54  ;;  %2849 = vmatprep.subr.bf16.mxu0 %v3112_v55  ;;  %v3162_v54 = vld [vmem:[#allocation2 + $0x320] sm:$0xff]  }
  0x5c   :  { %2871 = vmatprep.subr.bf16.mxu1 %v3113_v56  ;;  %v3163_v55 = vld [vmem:[#allocation2 + $0x3a0] sm:$0xff]   ;;  %v3164_v56 = vld [vmem:[#allocation2 + $0x368] sm:$0xff]  }
  0x5e   :  { %2850 = vmatpush3.bf16.msra.mxu0 %v3114_v57  ;;  %v3165_v57 = vld [vmem:[#allocation2 + $0x3e8] sm:$0xff]  }
  0x5f   :  { %2872 = vmatpush3.bf16.msra.mxu1 %v3115_v58  ;;  %2851 = vmatprep.subr.bf16.mxu0 %v3116_v59  ;;  %v3166_v58 = vld [vmem:[#allocation2 + $0x328] sm:$0xff]  }
  0x60   :  { %2873 = vmatprep.subr.bf16.mxu1 %v3117_v60  ;;  %v3167_v59 = vld [vmem:[#allocation2 + $0x3a8] sm:$0xff]   ;;  %v3168_v60 = vld [vmem:[#allocation2 + $0x370] sm:$0xff]  }
  0x62   :  { %2852 = vmatpush3.bf16.msra.mxu0 %v3118_v61  ;;  %v3169_v61 = vld [vmem:[#allocation2 + $0x3f0] sm:$0xff]  }
  0x63   :  { %2874 = vmatpush3.bf16.msra.mxu1 %v3119_v62  ;;  %2853 = vmatprep.subr.bf16.mxu0 %v3120_v63  ;;  %v3170_v62 = vld [vmem:[#allocation2 + $0x330] sm:$0xff]  }
  0x64   :  { %2875 = vmatprep.subr.bf16.mxu1 %v3121_v0  ;;  %v3171_v63 = vld [vmem:[#allocation2 + $0x3b0] sm:$0xff]   ;;  %v3172_v0 = vld [vmem:[#allocation2 + $0x378] sm:$0xff]  }
  0x66   :  { %2854 = vmatpush3.bf16.msra.mxu0 %v3122_v1  ;;  %v3173_v1 = vld [vmem:[#allocation2 + $0x3f8] sm:$0xff]  }
  0x67   :  { %2876 = vmatpush3.bf16.msra.mxu1 %v3123_v2  ;;  %2855 = vmatprep.subr.bf16.mxu0 %v3124_v3  ;;  %v3176_v2 = vld [vmem:[%s3496_s0 + $0xc] ss:$24 sps:$4 sm:$0xff]   ;;  %v3177_v3 = vld [vmem:[%s3496_s0 + $0x3c] ss:$24 sps:$4 sm:$0xff]  }
  0x68   :  { %2877 = vmatprep.subr.bf16.mxu1 %v3125_v4  ;;  %v3178_v4 = vld [vmem:[%s3496_s0 + $0x6c] ss:$24 sps:$4 sm:$0xff]  }
  0x6a   :  { %2856 = vmatpush3.bf16.msra.mxu0 %v3126_v5  ;;  %v3179_v5 = vld [vmem:[%s3496_s0 + $0x9c] ss:$24 sps:$4 sm:$0xff]  }
  0x6b   :  { %2878 = vmatpush3.bf16.msra.mxu1 %v3127_v6  ;;  %2857 = vmatprep.subr.bf16.mxu0 %v3128_v7  ;;  %v626_v6 = vrot.slane %v3176_v2, %v3343_v37  ;;  %v640_v7 = vrot.slane %v3177_v3, %v3343_v37  ;;  %v3221_v2 = vld [vmem:[#allocation2 + $0x5c0] sm:$0xff]  }
  0x6c   :  { %2879 = vmatprep.subr.bf16.mxu1 %v3129_v8  ;;  %v3174_v8 = vld [vmem:[#allocation2 + $0x338] sm:$0xff]  }
  0x6e   :  { %2858 = vmatpush3.bf16.msra.mxu0 %v3130_v9  ;;  %v654_v9 = vrot.slane %v3178_v4, %v3343_v37 }
  0x6f   :  { %2880 = vmatpush3.bf16.msra.mxu1 %v3131_v10  ;;  %2859 = vmatprep.subr.bf16.mxu0 %v3132_v11  ;;  %v668_v10 = vrot.slane %v3179_v5, %v3343_v37  ;;  %v3175_v11 = vld [vmem:[#allocation2 + $0x3b8] sm:$0xff]  }
  0x70   :  { %2881 = vmatprep.subr.bf16.mxu1 %v3133_v12  ;;  %v672_v12 = vcombine.high %v626_v6, %v640_v7 }
  0x71   :  { %v675_v15 = vcombine.low %v654_v9, %v668_v10 }
  0x72   :  { %2860 = vmatpush3.bf16.msra.mxu0 %v3134_v13  ;;  %v671_v13 = vcombine.low %v626_v6, %v640_v7  ;;  %v704_v17 = vrot.slane %v672_v12, %v3343_v37  ;;  %v3223_v12 = vld [vmem:[#allocation2 + $0x580] sm:$0xff]  }
  0x73   :  { %2882 = vmatpush3.bf16.msra.mxu1 %v3135_v14  ;;  %2889 = vmatprep.subr.bf16.mxu0 %v3144_v22  ;;  %v676_v14 = vcombine.high %v654_v9, %v668_v10  ;;  %v718_v21 = vrot.slane %v675_v15, %v3343_v37  ;;  %v3182_v22 = vld [vmem:[#allocation2 + $0x400] sm:$0xff]  }
  0x74   :  { %2911 = vmatprep.subr.bf16.mxu1 %v3145_v24  ;;  %v690_v18 = vrot.slane %v671_v13, %v3343_v37 }
  0x75   :  { %2250 = vmatmul.mubr.bf16.vlgmr.msra.gmra.mrb[8].mxu0 %v733_v38  ;;  %v732_v20 = vrot.slane %v676_v14, %v3343_v37  ;;  %v3193_v38 = vld [vmem:[#allocation2 + $0x4d8] sm:$0xff]  }
  0x76   :  { %2291 = vmatmul.mubr.bf16.vlgmr.msra.gmra.mrb[8].mxu1 %v734_v39  ;;  %2890 = vmatpush3.bf16.msra.mxu0 %v3146_v33  ;;  %v735_v26 = vcombine.low %v690_v18, %v718_v21  ;;  %v736_v27 = vcombine.high %v690_v18, %v718_v21  ;;  %v3189_v33 = vld [vmem:[#allocation2 + $0x4d0] sm:$0xff]   ;;  %v3194_v39 = vld [vmem:[#allocation2 + $0x418] sm:$0xff]   ;;  %v3225_v18 = vld [vmem:[#allocation2 + $0x5c8] sm:$0xff]  }
  0x77   :  { %2912 = vmatpush3.bf16.msra.mxu1 %v3147_v34  ;;  %2891 = vmatprep.subr.bf16.mxu0 %v3148_v40  ;;  %v739_v24 = vcombine.low %v704_v17, %v732_v20  ;;  %v740_v25 = vcombine.high %v704_v17, %v732_v20  ;;  %v3190_v34 = vld [vmem:[#allocation2 + $0x410] sm:$0xff]   ;;  %v3195_v40 = vld [vmem:[#allocation2 + $0x498] sm:$0xff]   ;;  %v3224_v17 = vld [vmem:[#allocation2 + $0x548] sm:$0xff]  }
  0x78   :  { %2913 = vmatprep.subr.bf16.mxu1 %v3149_v41  ;;  %v3196_v41 = vld [vmem:[#allocation2 + $0x460] sm:$0xff]   ;;  %v3227_v20 = vld [vmem:[#allocation2 + $0x588] sm:$0xff]   ;;  %v3228_v21 = vld [vmem:[#allocation2 + $0x550] sm:$0xff]  }
  0x79   :  { %2331 = vmatprep.mubr.bf16.mxu0 %v739_v24  ;;  %2372 = vmatprep.mubr.bf16.mxu1 %v740_v25  ;;  %v3231_v24 = vld [vmem:[#allocation2 + $0x590] sm:$0xff]   ;;  %v3232_v25 = vld [vmem:[#allocation2 + $0x558] sm:$0xff]  }
  0x7a   :  { %2892 = vmatpush3.bf16.msra.mxu0 %v3150_v42  ;;  %v3197_v42 = vld [vmem:[#allocation2 + $0x4e0] sm:$0xff]  }
  0x7b   :  { %2914 = vmatpush3.bf16.msra.mxu1 %v3151_v43  ;;  %2893 = vmatprep.subr.bf16.mxu0 %v3152_v44  ;;  %v3198_v43 = vld [vmem:[#allocation2 + $0x420] sm:$0xff]  }
  0x7c   :  { %2915 = vmatprep.subr.bf16.mxu1 %v3153_v45  ;;  %v3199_v44 = vld [vmem:[#allocation2 + $0x4a0] sm:$0xff]   ;;  %v3200_v45 = vld [vmem:[#allocation2 + $0x468] sm:$0xff]  }
  0x7e   :  { %2894 = vmatpush3.bf16.msra.mxu0 %v3154_v46  ;;  %v3201_v46 = vld [vmem:[#allocation2 + $0x4e8] sm:$0xff]  }
  0x7f   :  { %2916 = vmatpush3.bf16.msra.mxu1 %v3155_v47  ;;  %2895 = vmatprep.subr.bf16.mxu0 %v3156_v48  ;;  %v3202_v47 = vld [vmem:[#allocation2 + $0x428] sm:$0xff]  }
  0x80   :  { %2917 = vmatprep.subr.bf16.mxu1 %v3157_v49  ;;  %v3203_v48 = vld [vmem:[#allocation2 + $0x4a8] sm:$0xff]   ;;  %v3204_v49 = vld [vmem:[#allocation2 + $0x470] sm:$0xff]  }
  0x82   :  { %2896 = vmatpush3.bf16.msra.mxu0 %v3158_v50  ;;  %v3205_v50 = vld [vmem:[#allocation2 + $0x4f0] sm:$0xff]  }
  0x83   :  { %2918 = vmatpush3.bf16.msra.mxu1 %v3159_v51  ;;  %2897 = vmatprep.subr.bf16.mxu0 %v3160_v52  ;;  %v3206_v51 = vld [vmem:[#allocation2 + $0x430] sm:$0xff]  }
  0x84   :  { %2919 = vmatprep.subr.bf16.mxu1 %v3161_v53  ;;  %v3207_v52 = vld [vmem:[#allocation2 + $0x4b0] sm:$0xff]   ;;  %v3208_v53 = vld [vmem:[#allocation2 + $0x478] sm:$0xff]  }
  0x86   :  { %2898 = vmatpush3.bf16.msra.mxu0 %v3162_v54  ;;  %v3209_v54 = vld [vmem:[#allocation2 + $0x4f8] sm:$0xff]  }
  0x87   :  { %2920 = vmatpush3.bf16.msra.mxu1 %v3163_v55  ;;  %2899 = vmatprep.subr.bf16.mxu0 %v3164_v56  ;;  %v3210_v55 = vld [vmem:[#allocation2 + $0x438] sm:$0xff]  }
  0x88   :  { %2921 = vmatprep.subr.bf16.mxu1 %v3165_v57  ;;  %v3211_v56 = vld [vmem:[#allocation2 + $0x4b8] sm:$0xff]   ;;  %v3212_v57 = vld [vmem:[%s3496_s0 + $0x10] ss:$24 sps:$4 sm:$0xff]  }
  0x8a   :  { %2900 = vmatpush3.bf16.msra.mxu0 %v3166_v58  ;;  %v3214_v58 = vld [vmem:[%s3496_s0 + $0x40] ss:$24 sps:$4 sm:$0xff]  }
  0x8b   :  { %2922 = vmatpush3.bf16.msra.mxu1 %v3167_v59  ;;  %2901 = vmatprep.subr.bf16.mxu0 %v3168_v60  ;;  %v3216_v59 = vld [vmem:[%s3496_s0 + $0x70] ss:$24 sps:$4 sm:$0xff]   ;;  %v3218_v60 = vld [vmem:[%s3496_s0 + $0xa0] ss:$24 sps:$4 sm:$0xff]  }
  0x8c   :  { %2923 = vmatprep.subr.bf16.mxu1 %v3169_v61  ;;  %v755_v61 = vrot.slane %v3212_v57, %v3343_v37 }
  0x8e   :  { %2902 = vmatpush3.bf16.msra.mxu0 %v3170_v62  ;;  %v769_v62 = vrot.slane %v3214_v58, %v3343_v37 }
  0x8f   :  { %2924 = vmatpush3.bf16.msra.mxu1 %v3171_v63  ;;  %2903 = vmatprep.subr.bf16.mxu0 %v3172_v0  ;;  %v3220_v63 = vld [vmem:[#allocation2 + $0x540] sm:$0xff]   ;;  %v783_v0 = vrot.slane %v3216_v59, %v3343_v37 }
  0x90   :  { %2925 = vmatprep.subr.bf16.mxu1 %v3173_v1  ;;  %v797_v1 = vrot.slane %v3218_v60, %v3343_v37  ;;  %v806_v3 = vcombine.high %v755_v61, %v769_v62  ;;  %v805_v4 = vcombine.low %v755_v61, %v769_v62 }
  0x92   :  { %2904 = vmatpush3.bf16.msra.mxu0 %v3174_v8  ;;  %v810_v5 = vcombine.high %v783_v0, %v797_v1  ;;  %v809_v6 = vcombine.low %v783_v0, %v797_v1  ;;  %v833_v7 = vrot.slane %v806_v3, %v3343_v37  ;;  %v819_v8 = vrot.slane %v805_v4, %v3343_v37  ;;  %v2564_v4 = vld [vmem:[%s3498_s2] ss:$0 sm:$0xff] }
  0x93   :  { %2926 = vmatpush3.bf16.msra.mxu1 %v3175_v11  ;;  %2933 = vmatprep.subr.bf16.mxu0 %v3180_v16  ;;  %v3222_v11 = vld [vmem:[#allocation2 + $0x500] sm:$0xff]  }
  0x94   :  { %2955 = vmatprep.subr.bf16.mxu1 %v3181_v19  ;;  %v861_v9 = vrot.slane %v810_v5, %v3343_v37  ;;  %v847_v10 = vrot.slane %v809_v6, %v3343_v37  ;;  %v3226_v19 = vld [vmem:[#allocation2 + $0x508] sm:$0xff]  }
  0x95   :  { %2332 = vmatmul.mubr.bf16.vlgmr.msra.gmra.mrb[12].mxu0 %v735_v26  ;;  %v3233_v26 = vld [vmem:[#allocation2 + $0x5d8] sm:$0xff]  }
  0x96   :  { %2373 = vmatmul.mubr.bf16.vlgmr.msra.gmra.mrb[12].mxu1 %v736_v27  ;;  %2934 = vmatpush3.bf16.msra.mxu0 %v3182_v22  ;;  %v873_v13 = vcombine.low %v833_v7, %v861_v9  ;;  %v874_v14 = vcombine.high %v833_v7, %v861_v9  ;;  %v869_v15 = vcombine.low %v819_v8, %v847_v10  ;;  %v3229_v22 = vld [vmem:[#allocation2 + $0x5d0] sm:$0xff]   ;;  %v3234_v27 = vld [vmem:[#allocation2 + $0x518] sm:$0xff]  }
  0x97   :  { %2956 = vmatpush3.bf16.msra.mxu1 %v3183_v23  ;;  %2935 = vmatprep.subr.bf16.mxu0 %v3184_v28  ;;  %v870_v16 = vcombine.high %v819_v8, %v847_v10  ;;  %v3230_v23 = vld [vmem:[#allocation2 + $0x510] sm:$0xff]   ;;  %v3235_v28 = vld [vmem:[#allocation2 + $0x598] sm:$0xff]  }
  0x98   :  { %2957 = vmatprep.subr.bf16.mxu1 %v3185_v29  ;;  %2413 = vmatprep.mubr.bf16.mxu0 %v873_v13  ;;  %v3236_v29 = vld [vmem:[#allocation2 + $0x560] sm:$0xff]  }
  0x99   :  { %2454 = vmatprep.mubr.bf16.mxu1 %v874_v14 }
  0x9a   :  { %2936 = vmatpush3.bf16.msra.mxu0 %v3186_v30  ;;  %v3237_v30 = vld [vmem:[#allocation2 + $0x5e0] sm:$0xff]  }
  0x9b   :  { %2958 = vmatpush3.bf16.msra.mxu1 %v3187_v31  ;;  %2937 = vmatprep.subr.bf16.mxu0 %v3188_v32  ;;  %v3238_v31 = vld [vmem:[#allocation2 + $0x520] sm:$0xff]  }
  0x9c   :  { %2959 = vmatprep.subr.bf16.mxu1 %v3189_v33  ;;  %v3239_v32 = vld [vmem:[#allocation2 + $0x5a0] sm:$0xff]   ;;  %v3240_v33 = vld [vmem:[#allocation2 + $0x568] sm:$0xff]  }
  0x9e   :  { %2938 = vmatpush3.bf16.msra.mxu0 %v3190_v34  ;;  %v3241_v34 = vld [vmem:[#allocation2 + $0x5e8] sm:$0xff]  }
  0x9f   :  { %2960 = vmatpush3.bf16.msra.mxu1 %v3191_v35  ;;  %2939 = vmatprep.subr.bf16.mxu0 %v3192_v36  ;;  %v3242_v35 = vld [vmem:[#allocation2 + $0x528] sm:$0xff]  }
  0xa0   :  { %2961 = vmatprep.subr.bf16.mxu1 %v3193_v38  ;;  %v3243_v36 = vld [vmem:[#allocation2 + $0x5a8] sm:$0xff]   ;;  %v3244_v38 = vld [vmem:[#allocation2 + $0x570] sm:$0xff]  }
  0xa2   :  { %2940 = vmatpush3.bf16.msra.mxu0 %v3194_v39  ;;  %v3245_v39 = vld [vmem:[#allocation2 + $0x5f0] sm:$0xff]  }
  0xa3   :  { %2962 = vmatpush3.bf16.msra.mxu1 %v3195_v40  ;;  %2941 = vmatprep.subr.bf16.mxu0 %v3196_v41  ;;  %v3246_v40 = vld [vmem:[#allocation2 + $0x530] sm:$0xff]  }
  0xa4   :  { %2963 = vmatprep.subr.bf16.mxu1 %v3197_v42  ;;  %v3247_v41 = vld [vmem:[#allocation2 + $0x5b0] sm:$0xff]   ;;  %v3248_v42 = vld [vmem:[#allocation2 + $0x578] sm:$0xff]  }
  0xa6   :  { %2942 = vmatpush3.bf16.msra.mxu0 %v3198_v43  ;;  %v3249_v43 = vld [vmem:[#allocation2 + $0x5f8] sm:$0xff]  }
  0xa7   :  { %2964 = vmatpush3.bf16.msra.mxu1 %v3199_v44  ;;  %2943 = vmatprep.subr.bf16.mxu0 %v3200_v45  ;;  %v3252_v44 = vld [vmem:[%s3496_s0 + $0x14] ss:$24 sps:$4 sm:$0xff]   ;;  %v3253_v45 = vld [vmem:[%s3496_s0 + $0x44] ss:$24 sps:$4 sm:$0xff]  }
  0xa8   :  { %2965 = vmatprep.subr.bf16.mxu1 %v3201_v46  ;;  %v3254_v46 = vld [vmem:[%s3496_s0 + $0x74] ss:$24 sps:$4 sm:$0xff]  }
  0xaa   :  { %2944 = vmatpush3.bf16.msra.mxu0 %v3202_v47  ;;  %v3255_v47 = vld [vmem:[%s3496_s0 + $0xa4] ss:$24 sps:$4 sm:$0xff]  }
  0xab   :  { %2966 = vmatpush3.bf16.msra.mxu1 %v3203_v48  ;;  %2945 = vmatprep.subr.bf16.mxu0 %v3204_v49  ;;  %v762_v48 = vrot.slane %v3252_v44, %v3343_v37  ;;  %v776_v49 = vrot.slane %v3253_v45, %v3343_v37 }
  0xac   :  { %2967 = vmatprep.subr.bf16.mxu1 %v3205_v50  ;;  %v790_v50 = vrot.slane %v3254_v46, %v3343_v37 }
  0xae   :  { %2946 = vmatpush3.bf16.msra.mxu0 %v3206_v51  ;;  %v804_v51 = vrot.slane %v3255_v47, %v3343_v37 }
  0xaf   :  { %2968 = vmatpush3.bf16.msra.mxu1 %v3207_v52  ;;  %2947 = vmatprep.subr.bf16.mxu0 %v3208_v53  ;;  %v3250_v52 = vld [vmem:[#allocation2 + $0x538] sm:$0xff]  }
  0xb0   :  { %2969 = vmatprep.subr.bf16.mxu1 %v3209_v54  ;;  %v3251_v53 = vld [vmem:[#allocation2 + $0x5b8] sm:$0xff]   ;;  %v808_v54 = vcombine.high %v762_v48, %v776_v49  ;;  %v811_v57 = vcombine.low %v790_v50, %v804_v51 }
  0xb2   :  { %2948 = vmatpush3.bf16.msra.mxu0 %v3210_v55  ;;  %v812_v55 = vcombine.high %v790_v50, %v804_v51  ;;  %v840_v58 = vrot.slane %v808_v54, %v3343_v37  ;;  %v854_v61 = vrot.slane %v811_v57, %v3343_v37 }
  0xb3   :  { %2970 = vmatpush3.bf16.msra.mxu1 %v3211_v56  ;;  %2977 = vmatprep.subr.bf16.mxu0 %v3220_v63  ;;  %v807_v56 = vcombine.low %v762_v48, %v776_v49 }
  0xb4   :  { %2999 = vmatprep.subr.bf16.mxu1 %v3221_v2  ;;  %v868_v59 = vrot.slane %v812_v55, %v3343_v37 }
  0xb5   :  { %2414 = vmatmul.mubr.bf16.vlgmr.msra.gmra.mrb[16].mxu0 %v869_v15  ;;  %v826_v60 = vrot.slane %v807_v56, %v3343_v37 }
  0xb6   :  { %2455 = vmatmul.mubr.bf16.vlgmr.msra.gmra.mrb[16].mxu1 %v870_v16  ;;  %2978 = vmatpush3.bf16.msra.mxu0 %v3222_v11  ;;  %v875_v62 = vcombine.low %v840_v58, %v868_v59  ;;  %v876_v63 = vcombine.high %v840_v58, %v868_v59 }
  0xb7   :  { %3000 = vmatpush3.bf16.msra.mxu1 %v3223_v12  ;;  %2979 = vmatprep.subr.bf16.mxu0 %v3224_v17  ;;  %v871_v0 = vcombine.low %v826_v60, %v854_v61  ;;  %v872_v1 = vcombine.high %v826_v60, %v854_v61 }
  0xb8   :  { %3001 = vmatprep.subr.bf16.mxu1 %v3225_v18  ;;  %2495 = vmatprep.mubr.bf16.mxu0 %v875_v62 }
  0xb9   :  { %2536 = vmatprep.mubr.bf16.mxu1 %v876_v63 }
  0xba   :  { %2980 = vmatpush3.bf16.msra.mxu0 %v3226_v19 }
  0xbb   :  { %3002 = vmatpush3.bf16.msra.mxu1 %v3227_v20  ;;  %2981 = vmatprep.subr.bf16.mxu0 %v3228_v21 }
  0xbc   :  { %3003 = vmatprep.subr.bf16.mxu1 %v3229_v22 }
  0xbe   :  { %2982 = vmatpush3.bf16.msra.mxu0 %v3230_v23 }
  0xbf   :  { %3004 = vmatpush3.bf16.msra.mxu1 %v3231_v24  ;;  %2983 = vmatprep.subr.bf16.mxu0 %v3232_v25 }
  0xc0   :  { %3005 = vmatprep.subr.bf16.mxu1 %v3233_v26 }
  0xc2   :  { %2984 = vmatpush3.bf16.msra.mxu0 %v3234_v27 }
  0xc3   :  { %3006 = vmatpush3.bf16.msra.mxu1 %v3235_v28  ;;  %2985 = vmatprep.subr.bf16.mxu0 %v3236_v29 }
  0xc4   :  { %3007 = vmatprep.subr.bf16.mxu1 %v3237_v30 }
  0xc6   :  { %2986 = vmatpush3.bf16.msra.mxu0 %v3238_v31 }
  0xc7   :  { %3008 = vmatpush3.bf16.msra.mxu1 %v3239_v32  ;;  %2987 = vmatprep.subr.bf16.mxu0 %v3240_v33 }
  0xc8   :  { %3009 = vmatprep.subr.bf16.mxu1 %v3241_v34 }
  0xca   :  { %2988 = vmatpush3.bf16.msra.mxu0 %v3242_v35 }
  0xcb   :  { %3010 = vmatpush3.bf16.msra.mxu1 %v3243_v36  ;;  %2989 = vmatprep.subr.bf16.mxu0 %v3244_v38 }
  0xcc   :  { %3011 = vmatprep.subr.bf16.mxu1 %v3245_v39 }
  0xce   :  { %2990 = vmatpush3.bf16.msra.mxu0 %v3246_v40 }
  0xcf   :  { %3012 = vmatpush3.bf16.msra.mxu1 %v3247_v41  ;;  %2991 = vmatprep.subr.bf16.mxu0 %v3248_v42 }
  0xd0   :  { %3013 = vmatprep.subr.bf16.mxu1 %v3249_v43 }
  0xd2   :  { %2992 = vmatpush3.bf16.msra.mxu0 %v3250_v52 }
  0xd3   :  { %3014 = vmatpush3.bf16.msra.mxu1 %v3251_v53 }
  0xd5   :  { %2496 = vmatmul.mubr.bf16.vlgmr.msra.gmra.mrb[20].mxu0 %v871_v0 }
  0xd6   :  { %2537 = vmatmul.mubr.bf16.vlgmr.msra.gmra.mrb[20].mxu1 %v872_v1 }
 0x108   :  { %v2773_v2 = vpop.f32.mrb[0].mxu0 }
 0x109   :  { %v2795_v3 = vpop.f32.mrb[0].mxu1  ;;  %v2774_v5 = vpop.f32.mrb[1].mxu0 }
 0x10a   :  { %v2796_v6 = vpop.f32.mrb[1].mxu1  ;;  %v2775_v7 = vadd.f32 %v2774_v5, %v2773_v2  ;;  %v2776_v9 = vpop.f32.mrb[2].mxu0 }
 0x10b   :  { %v2797_v8 = vadd.f32 %v2796_v6, %v2795_v3  ;;  %v2798_v37 = vpop.f32.mrb[2].mxu1  ;;  %v2777_v10 = vpop.f32.mrb[3].mxu0 }
 0x10c   :  { %v2799_v11 = vpop.f32.mrb[3].mxu1  ;;  %v2088_v12 = vadd.f32 %v2775_v7, %v2564_v4  ;;  %v2778_v13 = vadd.f32 %v2777_v10, %v2776_v9 }
 0x10d   :  { %v2800_v14 = vadd.f32 %v2799_v11, %v2798_v37 }
 0x10e   :  { %v2129_v15 = vadd.f32 %v2797_v8, %v2088_v12  ;;  %v2091_v16 = vadd.f32 %v2778_v13, %v2564_v4 }
 0x110   :  { %v2132_v17 = vadd.f32 %v2800_v14, %v2091_v16 }
 0x128   :  { %v2817_v18 = vpop.f32.mrb[4].mxu0 }
 0x129   :  { %v2839_v19 = vpop.f32.mrb[4].mxu1  ;;  %v2818_v20 = vpop.f32.mrb[5].mxu0 }
 0x12a   :  { %v2840_v21 = vpop.f32.mrb[5].mxu1  ;;  %v2819_v22 = vadd.f32 %v2818_v20, %v2817_v18  ;;  %v2820_v24 = vpop.f32.mrb[6].mxu0 }
 0x12b   :  { %v2841_v23 = vadd.f32 %v2840_v21, %v2839_v19  ;;  %v2842_v25 = vpop.f32.mrb[6].mxu1  ;;  %v2821_v26 = vpop.f32.mrb[7].mxu0 }
 0x12c   :  { %v2843_v27 = vpop.f32.mrb[7].mxu1  ;;  %v2170_v28 = vadd.f32 %v2819_v22, %v2129_v15  ;;  %v2822_v29 = vadd.f32 %v2821_v26, %v2820_v24 }
 0x12d   :  { %v2844_v30 = vadd.f32 %v2843_v27, %v2842_v25 }
 0x12e   :  { %v2211_v31 = vadd.f32 %v2841_v23, %v2170_v28  ;;  %v2173_v32 = vadd.f32 %v2822_v29, %v2132_v17 }
 0x130   :  { %v2214_v33 = vadd.f32 %v2844_v30, %v2173_v32 }
 0x148   :  { %v2861_v34 = vpop.f32.mrb[8].mxu0 }
 0x149   :  { %v2883_v35 = vpop.f32.mrb[8].mxu1  ;;  %v2862_v36 = vpop.f32.mrb[9].mxu0 }
 0x14a   :  { %v2884_v38 = vpop.f32.mrb[9].mxu1  ;;  %v2863_v39 = vadd.f32 %v2862_v36, %v2861_v34  ;;  %v2864_v41 = vpop.f32.mrb[10].mxu0 }
 0x14b   :  { %v2885_v40 = vadd.f32 %v2884_v38, %v2883_v35  ;;  %v2886_v42 = vpop.f32.mrb[10].mxu1  ;;  %v2865_v43 = vpop.f32.mrb[11].mxu0 }
 0x14c   :  { %v2887_v44 = vpop.f32.mrb[11].mxu1  ;;  %v2252_v45 = vadd.f32 %v2863_v39, %v2211_v31  ;;  %v2866_v46 = vadd.f32 %v2865_v43, %v2864_v41 }
 0x14d   :  { %v2888_v47 = vadd.f32 %v2887_v44, %v2886_v42 }
 0x14e   :  { %v2293_v48 = vadd.f32 %v2885_v40, %v2252_v45  ;;  %v2255_v49 = vadd.f32 %v2866_v46, %v2214_v33 }
 0x150   :  { %v2296_v50 = vadd.f32 %v2888_v47, %v2255_v49 }
 0x168   :  { %v2905_v51 = vpop.f32.mrb[12].mxu0 }
 0x169   :  { %v2927_v52 = vpop.f32.mrb[12].mxu1  ;;  %v2906_v53 = vpop.f32.mrb[13].mxu0 }
 0x16a   :  { %v2928_v54 = vpop.f32.mrb[13].mxu1  ;;  %v2907_v55 = vadd.f32 %v2906_v53, %v2905_v51  ;;  %v2908_v57 = vpop.f32.mrb[14].mxu0 }
 0x16b   :  { %v2929_v56 = vadd.f32 %v2928_v54, %v2927_v52  ;;  %v2930_v58 = vpop.f32.mrb[14].mxu1  ;;  %v2909_v59 = vpop.f32.mrb[15].mxu0 }
 0x16c   :  { %v2931_v60 = vpop.f32.mrb[15].mxu1  ;;  %v2334_v61 = vadd.f32 %v2907_v55, %v2293_v48  ;;  %v2910_v62 = vadd.f32 %v2909_v59, %v2908_v57 }
 0x16d   :  { %v2932_v63 = vadd.f32 %v2931_v60, %v2930_v58 }
 0x16e   :  { %v2375_v0 = vadd.f32 %v2929_v56, %v2334_v61  ;;  %v2337_v1 = vadd.f32 %v2910_v62, %v2296_v50 }
 0x170   :  { %v2378_v2 = vadd.f32 %v2932_v63, %v2337_v1 }
 0x188   :  { %v2949_v3 = vpop.f32.mrb[16].mxu0 }
 0x189   :  { %v2971_v4 = vpop.f32.mrb[16].mxu1  ;;  %v2950_v5 = vpop.f32.mrb[17].mxu0 }
 0x18a   :  { %v2972_v6 = vpop.f32.mrb[17].mxu1  ;;  %v2951_v7 = vadd.f32 %v2950_v5, %v2949_v3  ;;  %v2952_v9 = vpop.f32.mrb[18].mxu0 }
 0x18b   :  { %v2973_v8 = vadd.f32 %v2972_v6, %v2971_v4  ;;  %v2974_v37 = vpop.f32.mrb[18].mxu1  ;;  %v2953_v10 = vpop.f32.mrb[19].mxu0 }
 0x18c   :  { %v2975_v11 = vpop.f32.mrb[19].mxu1  ;;  %v2416_v12 = vadd.f32 %v2951_v7, %v2375_v0  ;;  %v2954_v13 = vadd.f32 %v2953_v10, %v2952_v9 }
 0x18d   :  { %v2976_v14 = vadd.f32 %v2975_v11, %v2974_v37 }
 0x18e   :  { %v2457_v15 = vadd.f32 %v2973_v8, %v2416_v12  ;;  %v2419_v16 = vadd.f32 %v2954_v13, %v2378_v2 }
 0x190   :  { %v2460_v17 = vadd.f32 %v2976_v14, %v2419_v16 }
 0x1a8   :  { %v2993_v18 = vpop.f32.mrb[20].mxu0 }
 0x1a9   :  { %v3015_v19 = vpop.f32.mrb[20].mxu1  ;;  %v2994_v20 = vpop.f32.mrb[21].mxu0 }
 0x1aa   :  { %v3016_v21 = vpop.f32.mrb[21].mxu1  ;;  %v2995_v22 = vadd.f32 %v2994_v20, %v2993_v18  ;;  %v2996_v24 = vpop.f32.mrb[22].mxu0 }
 0x1ab   :  { %v3017_v23 = vadd.f32 %v3016_v21, %v3015_v19  ;;  %v3018_v25 = vpop.f32.mrb[22].mxu1  ;;  %v2997_v26 = vpop.f32.mrb[23].mxu0 }
 0x1ac   :  { %v3019_v27 = vpop.f32.mrb[23].mxu1  ;;  %v2498_v28 = vadd.f32 %v2995_v22, %v2457_v15  ;;  %v2998_v29 = vadd.f32 %v2997_v26, %v2996_v24 }
 0x1ad   :  { %v3020_v30 = vadd.f32 %v3019_v27, %v3018_v25 }
 0x1ae   :  { %v2539_v31 = vadd.f32 %v3017_v23, %v2498_v28  ;;  %v2501_v32 = vadd.f32 %v2998_v29, %v2460_v17 }
 0x1b0   :  { %2545 = vst [vmem:[#allocation5] sm:$0xff] %v2539_v31  ;;  %v2542_v33 = vadd.f32 %v3020_v30, %v2501_v32 }
 0x1b2   :  { %2546 = vst [vmem:[#allocation5 + $0x8] sm:$0xff] %v2542_v33 }
 0x1b3   :  { %2551 = vsyncadd [#allocation4], 224  ;;  %s3308_s2 = smov [#allocation5]  }
 0x1b4   :  { %s2552_s19 = sshll.u32 %s3308_s2, 4  ;;  %s2553_s19 = int_to_ptr.vmem [resolvable:$true] %s2552_s19 }
 0x1b5   :  { %s3278_s20 = scalar_lea.vmem %s2553_s19, 32  ;;  %s3282_s21 = scalar_lea.vmem %s2553_s19, 256 }
 0x1b6   :  { %p3279_p8 = scmp.ne.s32.totalorder %s2553_s19, %s3278_s20  ;;  %p3283_p9 = scmp.lt.s32.totalorder %s2553_s19, %s2553_s19 }
 0x1b7   :  { %p3284_p10 = scmp.lt.s32.totalorder %s3282_s21, %s3278_s20 }
 0x1b9   :  { %p3285_p11 = por %p3284_p10, %p3283_p9 }
 0x1bb   :  { %p3286_p12 = pnand %p3285_p11, %p3279_p8 }
 0x1bd   :  { %3289 = shalt.err (!%p3286_p12)
}
 0x1be   :  { %s3290_s24 = scalar_lea.hbm %s3499_s3, 32 }
 0x1bf   :  { %p3291_p13 = scmp.ne.s32.totalorder %s3499_s3, %s3290_s24  ;;  %p3294_p0 = scmp.lt.u32.totalorder %s3290_s24, %s3499_s3 }
 0x1c1   :  { %p3296_p1 = pnand %p3294_p0, %p3291_p13 }
 0x1c3   :  { %3299 = shalt.err (!%p3296_p1)
}
 0x1c4   :  { %s3309_s28 = smov 32   ;;  %s3310_s29 = smov 2  }
 0x1c5   :  { %2558 = dma.vmem_to_hbm [thread:$0]  %s2553_s19, 32, %s3499_s3, [#allocation4], %s3309_s28, %s3309_s28, %s3310_s29  }
 0x1c6   :  { %3302 = dma.done.wait [#allocation4], 256  }
 0x1c7   :  { %3303 = vsyncadd [#allocation4], 4294967040 }
 0x1c8   :  { %2562 = vsyncpa [#allocation3], 1 }
 0x1c9   :  { %2563 = vsyncpa [#allocation4], 1 }

</bundles_post_ra>
